<compile_context>
chip_gen: v7x
topology: tpu7x:2x2x1
jax: 0.10.0
libtpu: 0.0.40
codegen_flags: <defaults>
</compile_context>

<pallas_src>
import functools
import math

import jax
import jax.numpy as jnp
from jax.experimental import pallas as pl
from jax.experimental.pallas import tpu as pltpu


# ---------------------------------------------------------------------------
# Helpers
# ---------------------------------------------------------------------------
def _round_up(x, m):
    return ((x + m - 1) // m) * m


def _llama_hidden_dim(dim, multiple_of, ffn_dim_multiplier=None):
    hidden_dim = 4 * dim
    hidden_dim = int(2 * hidden_dim / 3)
    if ffn_dim_multiplier is not None:
        hidden_dim = int(ffn_dim_multiplier * hidden_dim)
    return multiple_of * ((hidden_dim + multiple_of - 1) // multiple_of)


def _vmem_capacity_bytes():
    """Physical VMEM of the current TPU; conservative fallback = 64 MiB (v7x)."""
    try:
        return int(pltpu.get_tpu_info().vmem_capacity_bytes)
    except Exception:
        return 64 * 1024 * 1024


def pick_tile_h(H, cap=256):
    """Largest multiple of 128 <= cap that divides H (no padded hidden compute);
    falls back to a padded tile only if H is not 128-aligned."""
    cap = max(128, (cap // 128) * 128)
    t = min(cap, (H // 128) * 128) if H >= 128 else 0
    while t >= 128:
        if H % t == 0:
            return t
        t -= 128
    return min(cap, _round_up(H, 128))


def pick_tile_m(M, D, tile_h, x_itemsize, w_itemsize, vmem_cap=None):
    """Size the row tile against the device VMEM budget and roofline:
    big tiles (up to 1024) on 128-MiB chips, up to 512 on 64-MiB chips, and
    always >= 2 row tiles when M allows (so both v7x TensorCores get work)."""
    if vmem_cap is None:
        vmem_cap = _vmem_capacity_bytes()
    budget = int(0.70 * vmem_cap)
    # Double-buffered weight tiles: fused w1|w3 slab + w2 tile (fixed per step).
    fixed = 2 * (D * 2 * tile_h * w_itemsize + tile_h * D * w_itemsize)
    # x tile (double-buffered) + out tile (double-buffered) + f32 accumulator.
    per_row = D * (2 * x_itemsize + 2 * x_itemsize + 4)
    cap = 1024 if vmem_cap >= 100 * 1024 * 1024 else 512
    fit = max(8, ((budget - fixed) // per_row) // 8 * 8)
    tile_m = max(8, min(cap, fit, _round_up(M, 8)))
    # Guarantee >= 2 row tiles for megacore sharding on multi-TC chips.
    if M > 8 and _round_up(M, tile_m) // tile_m < 2:
        tile_m = _round_up((M + 1) // 2, 8)
    return max(8, int(tile_m))


def pack_ffn_weights(w1t, w3t, w2t, tile_h):
    """ONE-TIME weight prep (do not call per forward pass).

    w1t/w3t: [D, H]   (pre-transposed vs. PyTorch nn.Linear's [out, in])
    w2t:     [H, D]
    Returns:
      w13: [Hk, D, 2*tile_h]  tile-major fused [w1^T tile | w3^T tile]
           -> each hidden-tile fetch is a single contiguous DMA.
      w2p: [H_pad, D]         (rows padded); a (k, 0) tile is already contiguous.
    Zero padding is numerically exact: silu(0) * 0 = 0 and padded w2 rows are 0.
    """
    D, H = w1t.shape
    H_pad = _round_up(H, tile_h)
    if H_pad != H:
        w1t = jnp.pad(w1t, ((0, 0), (0, H_pad - H)))
        w3t = jnp.pad(w3t, ((0, 0), (0, H_pad - H)))
        w2t = jnp.pad(w2t, ((0, H_pad - H), (0, 0)))
    Hk = H_pad // tile_h
    w13 = jnp.concatenate(
        [w1t.reshape(D, Hk, tile_h).transpose(1, 0, 2),
         w3t.reshape(D, Hk, tile_h).transpose(1, 0, 2)],
        axis=2)                                       # [Hk, D, 2*tile_h]
    return w13, w2t


# ---------------------------------------------------------------------------
# Kernel
# ---------------------------------------------------------------------------
def _ffn_kernel(x_ref, w13_ref, w2_ref, o_ref, acc_ref, *, tile_h):
    """Grid = (row tiles i, hidden tiles k); k is the reduction axis (last).

    x_ref   : (tile_m, D)        input row tile (same block across k)
    w13_ref : (D, 2*tile_h)      fused [w1^T | w3^T] for hidden tile k (contiguous)
    w2_ref  : (tile_h, D)        w2^T tile for hidden tile k
    o_ref   : (tile_m, D)        output row tile (same block across k)
    acc_ref : (tile_m, D) f32    VMEM accumulator scratch
    """
    k = pl.program_id(1)

    x = x_ref[...]
    # One fused MXU push covers both the gate (w1) and up (w3) projections.
    h = jnp.dot(x, w13_ref[...], preferred_element_type=jnp.float32)
    h1 = h[:, :tile_h]
    h3 = h[:, tile_h:]
    # SiLU(h1) * h3 in f32 (sigmoid's exp goes to the EUP slot).
    gated = (h1 * jax.nn.sigmoid(h1)) * h3
    partial = jnp.dot(gated.astype(w2_ref.dtype), w2_ref[...],
                      preferred_element_type=jnp.float32)

    @pl.when(k == 0)
    def _():
        acc_ref[...] = partial          # init from first partial (no zero-fill)

    @pl.when(k > 0)
    def _():
        acc_ref[...] += partial

    @pl.when(k == pl.num_programs(1) - 1)
    def _():
        o_ref[...] = acc_ref[...].astype(o_ref.dtype)


# ---------------------------------------------------------------------------
# pallas_call wrapper
# ---------------------------------------------------------------------------
@functools.partial(jax.jit, static_argnames=("tile_m",))
def _feed_forward_impl(x2, w13, w2p, *, tile_m):
    M, D = x2.shape
    Hk, _, two_th = w13.shape
    tile_h = two_th // 2
    H_pad = Hk * tile_h

    M_pad = _round_up(M, tile_m)
    if M_pad != M:
        x2 = jnp.pad(x2, ((0, M_pad - M), (0, 0)))

    x_b = x2.dtype.itemsize
    w_b = w13.dtype.itemsize

    # VMEM budget: double-buffered x / fused-weight / w2 / out tiles + f32 acc.
    est = (2 * tile_m * D * x_b            # x tile (double-buffered)
           + 2 * D * 2 * tile_h * w_b      # fused w1|w3 tile
           + 2 * tile_h * D * w_b          # w2 tile
           + 2 * tile_m * D * x_b          # out tile
           + tile_m * D * 4)               # f32 accumulator scratch
    phys = _vmem_capacity_bytes()
    vmem_limit = min(phys - 2 * 1024 * 1024,            # never exceed the chip
                     int(est * 1.25) + 2 * 1024 * 1024)  # ~25% headroom
    vmem_limit = int(max(vmem_limit, 16 * 1024 * 1024))

    grid = (M_pad // tile_m, Hk)
    cost = pl.CostEstimate(
        flops=6 * M_pad * D * H_pad,          # 2*M*D*H for each of w1, w3, w2
        transcendentals=M_pad * H_pad,        # sigmoid
        # Weights are re-streamed once per row tile.
        bytes_accessed=grid[0] * 3 * D * H_pad * w_b + 2 * M_pad * D * x_b,
    )

    out2 = pl.pallas_call(
        functools.partial(_ffn_kernel, tile_h=tile_h),
        out_shape=jax.ShapeDtypeStruct((M_pad, D), x2.dtype),
        grid_spec=pltpu.PrefetchScalarGridSpec(
            num_scalar_prefetch=0,
            grid=grid,
            in_specs=[
                # x row tile: same block across the reduction axis.
                pl.BlockSpec((tile_m, D), lambda i, k: (i, 0)),
                # Fused w1|w3 slab, tile-major -> one contiguous DMA per step.
                pl.BlockSpec((pl.Squeezed(), D, 2 * tile_h),
                             lambda i, k: (k, 0, 0)),
                # w2^T tile: tile_h contiguous rows of D.
                # TODO(synk): optionally pl.Buffered(3) on the weight specs for
                # latency-bound decode on 128-MiB VMEM chips (v6e).
                pl.BlockSpec((tile_h, D), lambda i, k: (k, 0)),
            ],
            out_specs=pl.BlockSpec((tile_m, D), lambda i, k: (i, 0)),
            scratch_shapes=[pltpu.VMEM((tile_m, D), jnp.float32)],
        ),
        compiler_params=pltpu.CompilerParams(
            # Row tiles are independent (megacore-parallel); hidden tiles are
            # the reduction.
            dimension_semantics=("parallel", "arbitrary"),
            vmem_limit_bytes=vmem_limit,
        ),
        cost_estimate=cost,
    )(x2, w13, w2p)

    return out2[:M]


def feed_forward(x, w13, w2p, *, tile_m=None):
    """x: [B, S, D]; (w13, w2p) from pack_ffn_weights().  Returns [B, S, D]."""
    B, S, D = x.shape
    M = B * S
    tile_h = w13.shape[2] // 2
    if tile_m is None:
        tile_m = pick_tile_m(M, D, tile_h, x.dtype.itemsize, w13.dtype.itemsize)
    out2 = _feed_forward_impl(x.reshape(M, D), w13, w2p, tile_m=int(tile_m))
    return out2.reshape(B, S, D)


# ---------------------------------------------------------------------------
# Reference + demo
# ---------------------------------------------------------------------------
def reference(x, w1t, w3t, w2t):
    h1 = jnp.dot(x, w1t)
    h3 = jnp.dot(x, w3t)
    return jnp.dot(jax.nn.silu(h1) * h3, w2t)


if __name__ == "__main__":
    # Small, consistent shapes: dim=128, multiple_of=128 -> hidden=384.
    dim = 128
    multiple_of = 128
    hidden = _llama_hidden_dim(dim, multiple_of)     # 384
    batch, seq = 2, 8

    key = jax.random.PRNGKey(0)
    kx, k1, k2, k3 = jax.random.split(key, 4)

    # Deterministic init matching nn.Linear's 1/sqrt(fan_in) uniform bound.
    b1 = 1.0 / math.sqrt(dim)
    b2 = 1.0 / math.sqrt(hidden)
    x = jax.random.normal(kx, (batch, seq, dim), dtype=jnp.float32)
    # Stored pre-transposed relative to PyTorch's (out_features, in_features).
    w1t = jax.random.uniform(k1, (dim, hidden), minval=-b1, maxval=b1,
                             dtype=jnp.float32)
    w3t = jax.random.uniform(k3, (dim, hidden), minval=-b1, maxval=b1,
                             dtype=jnp.float32)
    w2t = jax.random.uniform(k2, (hidden, dim), minval=-b2, maxval=b2,
                             dtype=jnp.float32)

    # One-time weight packing (hoisted out of the forward path).
    tile_h = pick_tile_h(hidden, cap=256)            # 128 here: divides 384 exactly
    w13, w2p = pack_ffn_weights(w1t, w3t, w2t, tile_h)
    w13, w2p = jax.block_until_ready((w13, w2p))

    out = feed_forward(x, w13, w2p)
    jax.block_until_ready(out)

    ref = reference(x, w1t, w3t, w2t)
    assert out.shape == (batch, seq, dim)
    assert jnp.allclose(out, ref, atol=1e-4, rtol=1e-4), "mismatch vs reference"

    print("KERNEL_OK")
</pallas_src>

<mosaic_0001>
module attributes {stable_mosaic.version = 11 : i64} {
  func.func @_ffn_kernel(%arg0: i32, %arg1: i32, %arg2: memref<8x128xf32, #tpu.memory_space<vmem>>, %arg3: memref<1x128x256xf32, #tpu.memory_space<vmem>>, %arg4: memref<128x128xf32, #tpu.memory_space<vmem>>, %arg5: memref<8x128xf32, #tpu.memory_space<vmem>>, %arg6: memref<8x128xf32, #tpu.memory_space<vmem>>) attributes {dimension_semantics = [#tpu.dimension_semantics<parallel>, #tpu.dimension_semantics<arbitrary>], iteration_bounds = array<i64: 2, 3>, scalar_prefetch = 0 : i64, scratch_operands = 1 : i64, tpu.core_type = #tpu.core_type<tc>, window_params = [{transform_indices = @transform_0, window_bounds = array<i64: 8, 128>}, {transform_indices = @transform_1, window_bounds = array<i64: 1, 128, 256>}, {transform_indices = @transform_2, window_bounds = array<i64: 128, 128>}, {transform_indices = @transform_3, window_bounds = array<i64: 8, 128>}]} {
    %c0 = arith.constant 0 : index
    %c0_0 = arith.constant 0 : index
    %0 = vector.load %arg2[%c0, %c0_0] : memref<8x128xf32, #tpu.memory_space<vmem>>, vector<8x128xf32>
    %c0_1 = arith.constant 0 : index
    %c0_2 = arith.constant 0 : index
    %c0_3 = arith.constant 0 : index
    %1 = vector.load %arg3[%c0_1, %c0_2, %c0_3] : memref<1x128x256xf32, #tpu.memory_space<vmem>>, vector<1x128x256xf32>
    %2 = vector.shape_cast %1 : vector<1x128x256xf32> to vector<128x256xf32>
    %cst = arith.constant dense<0.000000e+00> : vector<8x256xf32>
    %3 = tpu.matmul %0, %2, %cst {dimension_numbers = #tpu.dot_dimension_numbers<[1], [0], [0], [1], [0, 0, 1, 1], [], []>} : vector<8x128xf32>, vector<128x256xf32>, vector<8x256xf32> -> vector<8x256xf32>
    %4 = vector.extract_strided_slice %3 {offsets = [0, 0], sizes = [8, 128], strides = [1, 1]} : vector<8x256xf32> to vector<8x128xf32>
    %5 = vector.extract_strided_slice %3 {offsets = [0, 128], sizes = [8, 128], strides = [1, 1]} : vector<8x256xf32> to vector<8x128xf32>
    %6 = arith.negf %4 : vector<8x128xf32>
    %7 = math.exp %6 : vector<8x128xf32>
    %cst_4 = arith.constant 1.000000e+00 : f32
    %8 = vector.broadcast %cst_4 : f32 to vector<8x128xf32>
    %9 = arith.addf %8, %7 : vector<8x128xf32>
    %10 = arith.divf %8, %9 : vector<8x128xf32>
    %11 = arith.mulf %4, %10 : vector<8x128xf32>
    %12 = arith.mulf %11, %5 : vector<8x128xf32>
    %c0_5 = arith.constant 0 : index
    %c0_6 = arith.constant 0 : index
    %13 = vector.load %arg4[%c0_5, %c0_6] : memref<128x128xf32, #tpu.memory_space<vmem>>, vector<128x128xf32>
    %cst_7 = arith.constant dense<0.000000e+00> : vector<8x128xf32>
    %14 = tpu.matmul %12, %13, %cst_7 {dimension_numbers = #tpu.dot_dimension_numbers<[1], [0], [0], [1], [0, 0, 1, 1], [], []>} : vector<8x128xf32>, vector<128x128xf32>, vector<8x128xf32> -> vector<8x128xf32>
    %c0_i32 = arith.constant 0 : i32
    %15 = arith.cmpi eq, %arg1, %c0_i32 : i32
    %16 = arith.extui %15 : i1 to i32
    %c0_i32_8 = arith.constant 0 : i32
    %17 = arith.cmpi ne, %16, %c0_i32_8 : i32
    scf.if %17 {
      %c0_12 = arith.constant 0 : index
      %c0_13 = arith.constant 0 : index
      %24 = vector.load %arg6[%c0_12, %c0_13] : memref<8x128xf32, #tpu.memory_space<vmem>>, vector<8x128xf32>
      tpu.vector_store %arg6[%c0_12, %c0_13], %14 {strides = array<i32>} : memref<8x128xf32, #tpu.memory_space<vmem>>, vector<8x128xf32>,
    } else {
    }
    %c0_i32_9 = arith.constant 0 : i32
    %18 = arith.cmpi sgt, %arg1, %c0_i32_9 : i32
    %19 = arith.extui %18 : i1 to i32
    %c0_i32_10 = arith.constant 0 : i32
    %20 = arith.cmpi ne, %19, %c0_i32_10 : i32
    scf.if %20 {
      %c0_12 = arith.constant 0 : index
      %c0_13 = arith.constant 0 : index
      %24 = vector.load %arg6[%c0_12, %c0_13] : memref<8x128xf32, #tpu.memory_space<vmem>>, vector<8x128xf32>
      %25 = arith.addf %24, %14 : vector<8x128xf32>
      %c0_14 = arith.constant 0 : index
      %c0_15 = arith.constant 0 : index
      %26 = vector.load %arg6[%c0_14, %c0_15] : memref<8x128xf32, #tpu.memory_space<vmem>>, vector<8x128xf32>
      tpu.vector_store %arg6[%c0_14, %c0_15], %25 {strides = array<i32>} : memref<8x128xf32, #tpu.memory_space<vmem>>, vector<8x128xf32>,
    } else {
    }
    %c2_i32 = arith.constant 2 : i32
    %21 = arith.cmpi eq, %arg1, %c2_i32 : i32
    %22 = arith.extui %21 : i1 to i32
    %c0_i32_11 = arith.constant 0 : i32
    %23 = arith.cmpi ne, %22, %c0_i32_11 : i32
    scf.if %23 {
      %c0_12 = arith.constant 0 : index
      %c0_13 = arith.constant 0 : index
      %24 = vector.load %arg6[%c0_12, %c0_13] : memref<8x128xf32, #tpu.memory_space<vmem>>, vector<8x128xf32>
      %c0_14 = arith.constant 0 : index
      %c0_15 = arith.constant 0 : index
      %25 = vector.load %arg5[%c0_14, %c0_15] : memref<8x128xf32, #tpu.memory_space<vmem>>, vector<8x128xf32>
      tpu.vector_store %arg5[%c0_14, %c0_15], %24 {strides = array<i32>} : memref<8x128xf32, #tpu.memory_space<vmem>>, vector<8x128xf32>,
    } else {
    }
    return
  }
  func.func @transform_0(%arg0: i32, %arg1: i32) -> (i32, i32) {
    %c0_i32 = arith.constant 0 : i32
    %c0_i32_0 = arith.constant 0 : i32
    return %arg0, %c0_i32 : i32, i32
  }
  func.func @transform_1(%arg0: i32, %arg1: i32) -> (i32, i32, i32) {
    %c0_i32 = arith.constant 0 : i32
    %c0_i32_0 = arith.constant 0 : i32
    %c0_i32_1 = arith.constant 0 : i32
    return %arg1, %c0_i32, %c0_i32_0 : i32, i32, i32
  }
  func.func @transform_2(%arg0: i32, %arg1: i32) -> (i32, i32) {
    %c0_i32 = arith.constant 0 : i32
    %c0_i32_0 = arith.constant 0 : i32
    return %arg1, %c0_i32 : i32, i32
  }
  func.func @transform_3(%arg0: i32, %arg1: i32) -> (i32, i32) {
    %c0_i32 = arith.constant 0 : i32
    %c0_i32_0 = arith.constant 0 : i32
    return %arg0, %c0_i32 : i32, i32
  }
}

</mosaic_0001>

<bundles_post_ra>
// kernel: _feed_forward_impl.1
= control target key start
LH: loop header
LB: loop body
LE: loop exit
PB: predicated region body
PF: predicated region fallthrough
CT: control target
= control target key end

     0   :  { %s1558_s0 = inlined_call_operand.hbm [shape: f32[16,128], index: 0, kind: input, shape index: {}]   ;;  %s1559_s1 = inlined_call_operand.hbm [shape: f32[3,128,256], index: 1, kind: input, shape index: {}]   ;;  %s1560_s2 = inlined_call_operand.hbm [shape: f32[384,128], index: 2, kind: input, shape index: {}]   ;;  %s1561_s3 = inlined_call_operand.hbm [shape: f32[16,128], index: 3, kind: output, shape index: {}]  }
   0x1   :  { %1573 = sst [smem:[#allocation21_spill]] %s1559_s1 }
   0x2   :  { %1574 = sst [smem:[#allocation22_spill]] %s1561_s3 }
   0x3   :  { %8 = vsyncpa [#allocation4], 0 }
   0x4   :  { %10 = vsyncpa [#allocation4 + $0x1], 0 }
   0x5   :  { %11 = vsyncpa [#allocation7], 0 }
   0x6   :  { %13 = vsyncpa [#allocation7 + $0x1], 0 }
   0x7   :  { %14 = vsyncpa [#allocation5], 0 }
   0x8   :  { %16 = vsyncpa [#allocation5 + $0x1], 0  ;;  %s1137_s12 = smov 0   ;;  %s1139_s13 = smov 0  }
   0x9   :  { %s1141_s14 = smov 0   ;;  %s1143_s15 = smov 0  }
   0xa   :  { %s1145_s16 = smov 0   ;;  %s1147_s17 = smov 0  }
   0xb   :  { %s1149_s18 = smov 0   ;;  %s1151_s19 = smov 0  }
   0xc   :  { %s1153_s20 = smov 0   ;;  %s1155_s21 = smov 0  }
   0xd   :  { %s1157_s22 = smov 0  }
   0xe LB: > { %1575 = sst [smem:[#allocation13_spill]] %s1072_s14  ;;  %s31_s23 = sadd.s32 1, %s1096_s20  ;;  %s1104_s22 = sphi %s1157_s22, %s22_s22   ;;  %s1100_s21 = sphi %s1155_s21, %s1609_s21   ;;  %s1096_s20 = sphi %s1153_s20, %s1615_s20   ;;  %s1092_s19 = sphi %s1151_s19, %s1607_s19   ;;  %s1088_s18 = sphi %s1149_s18, %s1614_s18   ;;  %s1084_s17 = sphi %s1147_s17, %s1606_s17   ;;  %s1080_s16 = sphi %s1145_s16, %s1613_s16   ;;  %s1076_s15 = sphi %s1143_s15, %s1612_s15   ;;  %s1072_s14 = sphi %s1141_s14, %s1604_s14   ;;  %s1068_s13 = sphi %s1139_s13, %s1611_s13   ;;  %s1064_s12 = sphi %s1137_s12, %s1610_s12  }
   0xf   : > { %1576 = sst [smem:[#allocation14_spill]] %s1084_s17  ;;  %p49_p0 = scmp.eq.s32.totalorder %s1104_s22, 0 }
  0x10   : > { %1577 = sst [smem:[#allocation15_spill]] %s1092_s19  ;;  %s67_s24 = sadd.s32 1, %s1072_s14 }
  0x11   : > { %1578 = sst [smem:[#allocation16_spill]] %s1100_s21  ;;  %p74_p1 = scmp.ne.s32.totalorder %s1072_s14, %s1068_s13 }
  0x12   : > { %p1562_p4 = scmp.lt.s32.totalorder %s1104_s22, 6  ;;  %s174_s25 = sand.u32 1, %s1104_s22  }
  0x13   : > { %p76_p3 = por %p74_p1, %p49_p0  ;;  %s176_s26 = sand.u32 1, %s1072_s14  }
  0x14   : > { %s636_s27 = sshll.u32 %s176_s26, 8  ;;  %s655_s28 = sshll.u32 %s1096_s20, 12 }
  0x15   : > { %s1579_s1 = sld [smem:[#allocation21_spill]]  ;;  %s178_s5 = scalar_lea.vmem [#allocation6], %s636_s27 }
  0x16   : > { %s185_s6 = sshll.u32 %s178_s5, 4  ;;  %p1214_p5 = pnand %p1562_p4, %p76_p3  ;;  %s1210_s6 = int_to_ptr.vmem [resolvable:$true] %s185_s6 }
  0x17   : > { %s1218_s8 = sshll.u32 %s176_s26, 7  ;;  %s1220_s9 = scalar_lea.sflag [#allocation7], %s174_s25 }
  0x18   : > { %p1564_p7 = pneg %p1214_p5 }
  0x1b   : > { %s1208_s4 = scalar_lea.hbm %s1579_s1, %s655_s28  ;;  %s893_s28 = scalar_lea.hbm %s1579_s1, 12288 }
  0x1c   : > { %s888_s10 = scalar_lea.hbm %s1208_s4, 4096  ;;  %p894_p10 = scmp.lt.u32.totalorder %s1208_s4, %s1579_s1 }
  0x1d   : > { %p889_p6 = scmp.ne.s32.totalorder %s1208_s4, %s888_s10  ;;  %p895_p11 = scmp.lt.u32.totalorder %s893_s28, %s888_s10 }
  0x1e   : > { %p897_p13 = scmp.lt.u32.totalorder %s888_s10, %s1208_s4 }
  0x1f   : > { %p891_p8 = pnand %p1564_p7, %p889_p6  ;;  %p896_p12 = por %p895_p11, %p894_p10 }
  0x21   : > { %p892_p9 = pneg %p891_p8  ;;  %p898_p1 = por %p897_p13, %p896_p12 }
  0x23   : > { %p899_p3 = pnand %p898_p1, %p892_p9 }
  0x25   : > { %902 = shalt.err (!%p899_p3)
}
  0x26   : > { %s903_s25 = scalar_lea.vmem %s1210_s6, 4096  ;;  %s1106_s26 = smov [#allocation6]  }
  0x27   : > { %p904_p6 = scmp.ne.s32.totalorder %s1210_s6, %s903_s25  ;;  %s908_s5 = sshll.u32 %s1106_s26, 4  ;;  %s909_s5 = int_to_ptr.vmem [resolvable:$false] %s908_s5 }
  0x28   : > { %s910_s11 = scalar_lea.vmem %s909_s5, 8192  ;;  %p911_p2 = scmp.lt.s32.totalorder %s1210_s6, %s909_s5 }
  0x29   : > { %p906_p8 = pnand %p904_p6, %p1564_p7  ;;  %p912_p10 = scmp.lt.s32.totalorder %s910_s11, %s903_s25 }
  0x2b   : > { %p907_p4 = pneg %p906_p8  ;;  %p913_p11 = por %p912_p10, %p911_p2 }
  0x2d   : > { %p914_p12 = pnand %p913_p11, %p907_p4 }
  0x2f   : > { %917 = shalt.err (!%p914_p12)
}
  0x30   : > { %s1107_s10 = smov 256   ;;  %s1108_s27 = smov 16  }
  0x31   : > { %779 = dma.hbm_to_vmem [thread:$0]  (!%p1214_p5), %s1208_s4, 4096, %s1210_s6, %s1220_s9, %s1107_s10, %s1107_s10, %s1108_s27  }
  0x32   : > { %p642_p2 = scmp.ge.s32.totalorder %s1104_s22, 1  ;;  %s199_s28 = scalar_lea.vmem [#allocation8], %s1218_s8 }
  0x33   : > { %s1250_s29 = sshll.u32 %s199_s28, 4  ;;  %p214_p4 = scmp.lt.s32.totalorder %s1104_s22, 7  ;;  %s1378_s29 = int_to_ptr.vmem [resolvable:$true] %s1250_s29 }
  0x34   : > { %s1258_s25 = sadd.s32 4294967295, %s1104_s22   ;;  %s631_s4 = sadd.s32 4294967294, %s1104_s22  }
  0x35   : > { %p1253_p9 = pnand %p642_p2, %p214_p4  ;;  %p32_p13 = scmp.ge.s32.totalorder %s31_s23, 3 }
  0x36   : > { %s34_s6 = sadd.s32 1, %s1100_s21  ;;  %s41_s8 = sadd.s32 1, %s1084_s17 }
  0x37   : > { %s1581_s30 = scalar_select %p1253_p9, 1, 0 }
  0x38   : > { %s1617_s23 = smov (%p32_p13, %s31_s23), 0  ;;  %s1619_s6 = smov (!%p32_p13, %s34_s6), %s1100_s21 }
  0x39   : > { %1582 = sst [smem:[#allocation17_spill]] %s1617_s23  ;;  %p48_p1 = scmp.ne.s32.totalorder %s1084_s17, %s1080_s16 }
  0x3a   : > { %p54_p3 = scmp.ne.s32.totalorder %s1080_s16, %s1076_s15  ;;  %p36_p6 = scmp.ge.s32.totalorder %s1619_s6, 2 }
  0x3b   : > { %p55_p8 = scmp.eq.s32.totalorder %s1258_s25, 0  ;;  %p1280_p10 = por %p49_p0, %p48_p1 }
  0x3c   : > { %s64_s5 = ssub.s32 %s1096_s20, %s1617_s23  ;;  %s1621_s6 = smov (%p36_p6, %s1619_s6), 0 }
  0x3d   : > { %1584 = sst [smem:[#allocation18_spill]] %s1621_s6  ;;  %p1291_p11 = por %p55_p8, %p54_p3 }
  0x3e   : > { %p65_p12 = scmp.eq.s32.totalorder %s64_s5, 0  ;;  %s38_s10 = ssub.s32 %s1100_s21, %s1621_s6 }
  0x3f   : > { %s1585_s11 = scalar_select %p1291_p11, 1, 0 }
  0x40   : > { %p1586_p2 = scmp.ne.s32.totalorder %s1068_s13, %s1064_s12  ;;  %p39_p0 = scmp.eq.s32.totalorder %s38_s10, 0 }
  0x41   : > { %p130_p13 = scmp.eq.s32.totalorder %s1258_s25, 5  ;;  %p136_p7 = scmp.eq.s32.totalorder %s631_s4, 5 }
  0x42   : > { %p1300_p4 = por %p1586_p2, %p55_p8  ;;  %s156_s5 = sand.u32 1, %s1084_s17  }
  0x43   : > { %s1308_s28 = scalar_select %p65_p12, %s1072_s14, %s67_s24  }
  0x44   : > { %s1587_s27 = scalar_select %p1300_p4, 1, 0 }
  0x45   : > { %1588 = sst [smem:[#allocation19_spill]] %s1308_s28  ;;  %p1316_p6 = por %p130_p13, %p48_p1 }
  0x46   : > { %s1311_s1 = scalar_select %p39_p0, %s1084_s17, %s41_s8  }
  0x47   : > { %s1590_s23 = scalar_select %p1316_p6, 1, 0 }
  0x48   : > { %1589 = sst [smem:[#allocation20_spill]] %s1311_s1  ;;  %s635_s12 = sshll.u32 %s1100_s21, 7 }
  0x49   : > { %p1325_p8 = por %p136_p7, %p54_p3  ;;  %s634_s10 = sshll.u32 %s156_s5, 3 }
  0x4a   : > { %s1332_s24 = scalar_lea.hbm %s1558_s0, %s635_s12  ;;  %p1592_p12 = scmp.lt.s32.totalorder %s1104_s22, 6 }
  0x4b   : > { %s1591_s6 = scalar_select %p1325_p8, 1, 0 }
  0x4c   : > { %p1338_p1 = pnand %p1592_p12, %p1280_p10  ;;  %s160_s8 = scalar_lea.vmem [#allocation3], %s634_s10 }
  0x4d   : > { %s167_s21 = sshll.u32 %s160_s8, 4  ;;  %s656_s1 = sshll.u32 %s1096_s20, 11  ;;  %s1343_s21 = int_to_ptr.vmem [resolvable:$true] %s167_s21 }
  0x4e   : > { %s157_s3 = scalar_lea.sflag [#allocation4], %s156_s5  ;;  %s918_s19 = scalar_lea.hbm %s1332_s24, 128 }
  0x4f   : > { %p919_p7 = scmp.ne.s32.totalorder %s1332_s24, %s918_s19  ;;  %p920_p3 = pneg %p1338_p1 }
  0x50   : > { %s923_s17 = scalar_lea.hbm %s1558_s0, 256  ;;  %p924_p10 = scmp.lt.u32.totalorder %s1332_s24, %s1558_s0 }
  0x51   : > { %p921_p2 = pnand %p920_p3, %p919_p7  ;;  %p925_p13 = scmp.lt.u32.totalorder %s923_s17, %s918_s19 }
  0x52   : > { %p927_p8 = scmp.lt.u32.totalorder %s918_s19, %s1332_s24 }
  0x53   : > { %p922_p0 = pneg %p921_p2  ;;  %p926_p12 = por %p925_p13, %p924_p10 }
  0x55   : > { %p928_p6 = por %p927_p8, %p926_p12 }
  0x57   : > { %p929_p4 = pnand %p928_p6, %p922_p0 }
  0x59   : > { %932 = shalt.err (!%p929_p4)
}
  0x5a   : > { %s933_s5 = scalar_lea.vmem %s1343_s21, 128  ;;  %s1109_s10 = smov [#allocation3]  }
  0x5b   : > { %p934_p7 = scmp.ne.s32.totalorder %s1343_s21, %s933_s5  ;;  %s938_s8 = sshll.u32 %s1109_s10, 4  ;;  %s939_s8 = int_to_ptr.vmem [resolvable:$false] %s938_s8 }
  0x5c   : > { %s940_s14 = scalar_lea.vmem %s939_s8, 256  ;;  %p941_p9 = scmp.lt.s32.totalorder %s1343_s21, %s939_s8 }
  0x5d   : > { %p936_p2 = pnand %p934_p7, %p920_p3  ;;  %p942_p10 = scmp.lt.s32.totalorder %s940_s14, %s933_s5 }
  0x5f   : > { %p937_p11 = pneg %p936_p2  ;;  %p943_p13 = por %p942_p10, %p941_p9 }
  0x61   : > { %p944_p8 = pnand %p943_p13, %p937_p11 }
  0x63   : > { %947 = shalt.err (!%p944_p8)
}
  0x64   : > { %776 = dma.hbm_to_vmem [thread:$0]  (!%p1338_p1), %s1332_s24, 128, %s1343_s21, %s157_s3  }
  0x65   : > { %s1375_s19 = scalar_lea.hbm %s1560_s2, %s656_s1  ;;  %p1594_p11 = pneg %p1214_p5 }
  0x66   : > { %s948_s26 = scalar_lea.hbm %s1375_s19, 2048  ;;  %s953_s24 = scalar_lea.hbm %s1560_s2, 6144 }
  0x67   : > { %p949_p9 = scmp.ne.s32.totalorder %s1375_s19, %s948_s26  ;;  %p954_p1 = scmp.lt.u32.totalorder %s1375_s19, %s1560_s2 }
  0x68   : > { %p955_p3 = scmp.lt.u32.totalorder %s953_s24, %s948_s26  ;;  %p957_p12 = scmp.lt.u32.totalorder %s948_s26, %s1375_s19 }
  0x69   : > { %p951_p4 = pnand %p949_p9, %p1594_p11 }
  0x6a   : > { %p956_p0 = por %p955_p3, %p954_p1 }
  0x6b   : > { %p952_p6 = pneg %p951_p4 }
  0x6c   : > { %p958_p7 = por %p957_p12, %p956_p0 }
  0x6e   : > { %p959_p2 = pnand %p958_p7, %p952_p6 }
  0x70   : > { %962 = shalt.err (!%p959_p2)
}
  0x71   : > { %s963_s1 = scalar_lea.vmem %s1378_s29, 2048  ;;  %p1595_p13 = pmov %p1594_p11 }
  0x72   : > { %p964_p10 = scmp.ne.s32.totalorder %s1378_s29, %s963_s1  ;;  %s1110_s5 = smov [#allocation8]  }
  0x73   : > { %s968_s10 = sshll.u32 %s1110_s5, 4  ;;  %s969_s10 = int_to_ptr.vmem [resolvable:$false] %s968_s10 }
  0x74   : > { %p966_p8 = pnand %p964_p10, %p1595_p13  ;;  %s970_s8 = scalar_lea.vmem %s969_s10, 4096 }
  0x75   : > { %p971_p11 = scmp.lt.s32.totalorder %s1378_s29, %s969_s10  ;;  %p972_p4 = scmp.lt.s32.totalorder %s970_s8, %s963_s1 }
  0x76   : > { %p967_p9 = pneg %p966_p8 }
  0x77   : > { %p973_p1 = por %p972_p4, %p971_p11 }
  0x79   : > { %p974_p3 = pnand %p973_p1, %p967_p9 }
  0x7b   : > { %977 = shalt.err (!%p974_p3)
}
  0x7c   : > { %s1111_s14 = smov 128   ;;  %s1112_s17 = smov 8  }
  0x7d   : > { %782 = dma.hbm_to_vmem [thread:$0]  (!%p1214_p5), %s1375_s19, 2048, %s1378_s29, %s1220_s9, %s1111_s14, %s1111_s14, %s1112_s17  }
  0x7e   : > { %p1596_p6 = scmp.ne.s32.totalorder %s1581_s30, 0 }
  0x7f   : > { %s1407_s28 = sand.u32 (!%p1596_p6), 1, %s1080_s16   ;;  %p1597_p0 = scmp.ne.s32.totalorder (!%p1596_p6), %s1585_s11, 0 }
  0x80   : > { %218 = sbr.rel (%p1596_p6) target bundleno = 677 (0x2a5), region = 32  ;;  %s643_s26 = sshll.u32 (!%p1596_p6), %s1407_s28, 3 }
  0x81   : > { %s221_s4 = scalar_lea.sflag (!%p1596_p6), [#allocation4], %s1407_s28  ;;  %s1413_s21 = scalar_lea.vmem (!%p1596_p6), [#allocation3], %s643_s26 }
  0x87   : > { %1051 = dma.done.wait (%p1597_p0), %s221_s4, 128  }
  0x88   : > { %1053 = vsyncadd (%p1597_p0), %s221_s4, 4294967168  ;;  %s229_s7 = sand.u32 1, %s1258_s25   ;;  %s231_s9 = sand.u32 1, %s1068_s13  }
  0x89   : > { %s644_s29 = sshll.u32 %s231_s9, 8  ;;  %s230_s30 = scalar_lea.sflag [#allocation7], %s229_s7 }
  0x8a   : > { %s1423_s19 = scalar_lea.vmem [#allocation6], %s644_s29  ;;  %p1598_p5 = scmp.ne.s32.totalorder %s1587_s27, 0 }
  0x8c   : > { %1055 = dma.done.wait (%p1598_p5), %s230_s30, 6144  }
  0x8d   : > { %1057 = vsyncadd (%p1598_p5), %s230_s30, 4294961152  ;;  %v1113_v0 = vmov 0.0   ;;  %v1114_v1 = vmov 0.0|0.0   ;;  %v278_v2 = vld [vmem:[%s1423_s19 + $0x8] sm:$0xff]  ;;  %v280_v3 = vld [vmem:[%s1423_s19 + $0x18] sm:$0xff]  ;;  %s645_s25 = sshll.u32 %s231_s9, 7 }
  0x8e   : > { %373 = vmatprep.mubr.f32.mxu0 %v1113_v0  ;;  %741 = vmatprep.subr.bf16.mxu1 %v1114_v1  ;;  %v277_v4 = vld [vmem:[%s1423_s19] sm:$0xff]  ;;  %v709_v5 = vpack.c.bf16 %v280_v3, %v278_v2  ;;  %v279_v6 = vld [vmem:[%s1423_s19 + $0x10] sm:$0xff]  ;;  %v282_v7 = vld [vmem:[%s1423_s19 + $0x28] sm:$0xff]  ;;  %s1466_s11 = scalar_lea.vmem [#allocation8], %s645_s25  ;;  %vm1115_vm0 = vmmov 0   ;;  %s274_s27 = scalar_lea.vmem [#allocation9], %s643_s26 }
  0x8f   : > { %v284_v8 = vld [vmem:[%s1423_s19 + $0x38] sm:$0xff]  ;;  %v711_v9 = vpack.c.bf16 %v279_v6, %v277_v4  ;;  %v281_v11 = vld [vmem:[%s1423_s19 + $0x20] sm:$0xff]  ;;  %v283_v12 = vld [vmem:[%s1423_s19 + $0x30] sm:$0xff]  ;;  %706 = vmatprep.mubr.msk.f32.mxu1 %vm1115_vm0, %v1113_v0  ;;  %p648_p12 = scmp.ne.s32.totalorder %s1088_s18, 0 }
  0x90   : > { %v713_v10 = vpack.c.bf16 %v284_v8, %v282_v7  ;;  %v286_v13 = vld [vmem:[%s1423_s19 + $0x48] sm:$0xff]  ;;  %710 = vmatprep.subr.bf16.mxu0 %v709_v5  ;;  %v288_v14 = vld [vmem:[%s1423_s19 + $0x58] sm:$0xff]  ;;  %v715_v15 = vpack.c.bf16 %v283_v12, %v281_v11  ;;  %v285_v17 = vld [vmem:[%s1423_s19 + $0x40] sm:$0xff] }
  0x91   : > { %712 = vmatpush1.bf16.msra.mxu0 %v711_v9  ;;  %v717_v16 = vpack.c.bf16 %v288_v14, %v286_v13  ;;  %v287_v18 = vld [vmem:[%s1423_s19 + $0x50] sm:$0xff]  ;;  %v290_v19 = vld [vmem:[%s1423_s19 + $0x68] sm:$0xff]  ;;  %v292_v20 = vld [vmem:[%s1423_s19 + $0x78] sm:$0xff] }
  0x92   : > { %714 = vmatprep.subr.bf16.mxu0 %v713_v10  ;;  %v719_v21 = vpack.c.bf16 %v287_v18, %v285_v17  ;;  %v721_v22 = vpack.c.bf16 %v292_v20, %v290_v19  ;;  %v289_v23 = vld [vmem:[%s1423_s19 + $0x60] sm:$0xff]  ;;  %v291_v24 = vld [vmem:[%s1423_s19 + $0x70] sm:$0xff]  ;;  %v294_v25 = vld [vmem:[%s1423_s19 + $0x88] sm:$0xff] }
  0x93   : > { %v296_v26 = vld [vmem:[%s1423_s19 + $0x98] sm:$0xff]  ;;  %v723_v27 = vpack.c.bf16 %v291_v24, %v289_v23  ;;  %v293_v29 = vld [vmem:[%s1423_s19 + $0x80] sm:$0xff]  ;;  %v295_v30 = vld [vmem:[%s1423_s19 + $0x90] sm:$0xff] }
  0x94   : > { %v725_v28 = vpack.c.bf16 %v296_v26, %v294_v25  ;;  %v298_v31 = vld [vmem:[%s1423_s19 + $0xa8] sm:$0xff]  ;;  %v300_v32 = vld [vmem:[%s1423_s19 + $0xb8] sm:$0xff]  ;;  %v727_v33 = vpack.c.bf16 %v295_v30, %v293_v29  ;;  %v297_v35 = vld [vmem:[%s1423_s19 + $0xa0] sm:$0xff] }
  0x95   : > { %716 = vmatpush1.bf16.msra.mxu0 %v715_v15  ;;  %v729_v34 = vpack.c.bf16 %v300_v32, %v298_v31  ;;  %v299_v36 = vld [vmem:[%s1423_s19 + $0xb0] sm:$0xff]  ;;  %v302_v37 = vld [vmem:[%s1423_s19 + $0xc8] sm:$0xff]  ;;  %v304_v38 = vld [vmem:[%s1423_s19 + $0xd8] sm:$0xff] }
  0x96   : > { %718 = vmatprep.subr.bf16.mxu0 %v717_v16  ;;  %v731_v39 = vpack.c.bf16 %v299_v36, %v297_v35  ;;  %v733_v40 = vpack.c.bf16 %v304_v38, %v302_v37  ;;  %v301_v41 = vld [vmem:[%s1423_s19 + $0xc0] sm:$0xff]  ;;  %v303_v42 = vld [vmem:[%s1423_s19 + $0xd0] sm:$0xff]  ;;  %v306_v43 = vld [vmem:[%s1423_s19 + $0xe8] sm:$0xff] }
  0x97   : > { %v308_v44 = vld [vmem:[%s1423_s19 + $0xf8] sm:$0xff]  ;;  %v735_v45 = vpack.c.bf16 %v303_v42, %v301_v41  ;;  %v305_v47 = vld [vmem:[%s1423_s19 + $0xe0] sm:$0xff]  ;;  %v307_v48 = vld [vmem:[%s1423_s19 + $0xf0] sm:$0xff] }
  0x98   : > { %v737_v46 = vpack.c.bf16 %v308_v44, %v306_v43  ;;  %v739_v49 = vpack.c.bf16 %v307_v48, %v305_v47  ;;  %v276_v50 = vld [vmem:[%s1413_s21] sm:$0xff]  ;;  %v388_v51 = vld [vmem:[%s1466_s11] sm:$0xff]  ;;  %v389_v52 = vld [vmem:[%s1466_s11 + $0x8] sm:$0xff] }
  0x99   : > { %720 = vmatpush1.bf16.msra.mxu0 %v719_v21  ;;  %v742_v53 = vpack.c.bf16 %v389_v52, %v388_v51  ;;  %v390_v54 = vld [vmem:[%s1466_s11 + $0x10] sm:$0xff]  ;;  %v391_v55 = vld [vmem:[%s1466_s11 + $0x18] sm:$0xff]  ;;  %v392_v57 = vld [vmem:[%s1466_s11 + $0x20] sm:$0xff] }
  0x9a   : > { %722 = vmatprep.subr.bf16.mxu0 %v721_v22  ;;  %v745_v56 = vpack.c.bf16 %v391_v55, %v390_v54  ;;  %v393_v58 = vld [vmem:[%s1466_s11 + $0x28] sm:$0xff]  ;;  %v394_v60 = vld [vmem:[%s1466_s11 + $0x30] sm:$0xff]  ;;  %v395_v61 = vld [vmem:[%s1466_s11 + $0x38] sm:$0xff] }
  0x9b   : > { %743 = vmatpush3.bf16.msra.mxu1 %v742_v53  ;;  %v748_v59 = vpack.c.bf16 %v393_v58, %v392_v57  ;;  %v751_v62 = vpack.c.bf16 %v395_v61, %v394_v60  ;;  %v396_v63 = vld [vmem:[%s1466_s11 + $0x40] sm:$0xff]  ;;  %v397_v2 = vld [vmem:[%s1466_s11 + $0x48] sm:$0xff]  ;;  %v398_v4 = vld [vmem:[%s1466_s11 + $0x50] sm:$0xff] }
  0x9c   : > { %744 = vmatprep.subr.bf16.mxu1 %v1114_v1  ;;  %v754_v3 = vpack.c.bf16 %v397_v2, %v396_v63  ;;  %v399_v5 = vld [vmem:[%s1466_s11 + $0x58] sm:$0xff]  ;;  %v400_v7 = vld [vmem:[%s1466_s11 + $0x60] sm:$0xff]  ;;  %v401_v8 = vld [vmem:[%s1466_s11 + $0x68] sm:$0xff] }
  0x9d   : > { %724 = vmatpush1.bf16.msra.mxu0 %v723_v27  ;;  %v757_v6 = vpack.c.bf16 %v399_v5, %v398_v4  ;;  %v760_v9 = vpack.c.bf16 %v401_v8, %v400_v7  ;;  %v402_v10 = vld [vmem:[%s1466_s11 + $0x70] sm:$0xff]  ;;  %v403_v11 = vld [vmem:[%s1466_s11 + $0x78] sm:$0xff] }
  0x9e   : > { %726 = vmatprep.subr.bf16.mxu0 %v725_v28  ;;  %v763_v12 = vpack.c.bf16 %v403_v11, %v402_v10 }
  0x9f   : > { %746 = vmatpush3.bf16.msra.mxu1 %v745_v56 }
  0xa0   : > { %747 = vmatprep.subr.bf16.mxu1 %v1114_v1 }
  0xa1   : > { %728 = vmatpush1.bf16.msra.mxu0 %v727_v33 }
  0xa2   : > { %730 = vmatprep.subr.bf16.mxu0 %v729_v34 }
  0xa3   : > { %749 = vmatpush3.bf16.msra.mxu1 %v748_v59 }
  0xa4   : > { %750 = vmatprep.subr.bf16.mxu1 %v1114_v1 }
  0xa5   : > { %732 = vmatpush1.bf16.msra.mxu0 %v731_v39 }
  0xa6   : > { %734 = vmatprep.subr.bf16.mxu0 %v733_v40 }
  0xa7   : > { %752 = vmatpush3.bf16.msra.mxu1 %v751_v62 }
  0xa8   : > { %753 = vmatprep.subr.bf16.mxu1 %v1114_v1 }
  0xa9   : > { %736 = vmatpush1.bf16.msra.mxu0 %v735_v45 }
  0xaa   : > { %738 = vmatprep.subr.bf16.mxu0 %v737_v46 }
  0xab   : > { %755 = vmatpush3.bf16.msra.mxu1 %v754_v3 }
  0xac   : > { %756 = vmatprep.subr.bf16.mxu1 %v1114_v1 }
  0xad   : > { %740 = vmatpush1.bf16.msra.mxu0 %v739_v49 }
  0xaf   : > { %758 = vmatpush3.bf16.msra.mxu1 %v757_v6 }
  0xb0   : > { %374 = vmatmul.mubr.f32.vlgmr.msra.gmra.mrb[0].mxu0 %v276_v50  ;;  %759 = vmatprep.subr.bf16.mxu1 %v1114_v1 }
  0xb3   : > { %761 = vmatpush3.bf16.msra.mxu1 %v760_v9 }
  0xb4   : > { %762 = vmatprep.subr.bf16.mxu1 %v1114_v1 }
  0xb7   : > { %764 = vmatpush3.bf16.msra.mxu1 %v763_v12 }
 0x183   : > { %v375_v13 = vpop.f32.mrb[0].mxu0 }
 0x184   : > { %v647_v14 = vmul.f32 -1.442695, %v375_v13  ;;  %v377_v15 = vpop.f32.mrb[1].mxu0 }
 0x186   : > { %884 = vpow2.f32 %v647_v14 }
 0x190   : > { %v885_v16 = vpop.eup %884 }
 0x191   : > { %v383_v17 = vadd.f32 1.0, %v885_v16 }
 0x193   : > { %886 = vrcp.f32 %v383_v17 }
 0x19d   : > { %v887_v18 = vpop.eup %886 }
 0x19e   : > { %v386_v19 = vmul.f32 %v887_v18, %v375_v13 }
 0x1a0   : > { %v387_v20 = vmul.f32 %v386_v19, %v377_v15 }
 0x1a2   : > { %707 = vmatmul.mubr.f32.vlgmr.msra.gmra.mrb[0].mxu1 %v387_v20 }
 0x270   : > { %477 = sbr.rel (%p648_p12) target bundleno = 631 (0x277), region = 48 }
 0x275   : > { %v470_v1 = vpop.f32.mrb[0].mxu1 }
 0x276   : > { %v708_v21 = vpop.f32.mrb[1].mxu1  ;;  %478 = vst [vmem:[#allocation2] sm:$0xff] (!%p648_p12), %v470_v1 }
 0x277 PF: > { %p649_p7 = scmp.le.s32.totalorder %s1088_s18, 0 }
 0x279   : > { %482 = sbr.rel (%p649_p7) target bundleno = 641 (0x281), region = 52 }
 0x27d   : > { %v483_v0 = vld [vmem:[#allocation2] sm:$0xff] (!%p649_p7) }
 0x27e   : > { %v484_v22 = vadd.f32 (!%p649_p7), %v483_v0, %v470_v1 }
 0x280   : > { %485 = vst [vmem:[#allocation2] sm:$0xff] %v484_v22 }
 0x281 PF: > { %p650_p2 = scmp.ne.s32.totalorder %s1088_s18, 2 }
 0x283   : > { %489 = sbr.rel (%p650_p2) target bundleno = 650 (0x28a), region = 56 }
 0x287   : > { %v490_v23 = vld [vmem:[#allocation2] sm:$0xff] (!%p650_p2) }
 0x288   : > { %491 = vst [vmem:[%s274_s27] sm:$0xff] (!%p650_p2), %v490_v23 }
 0x28a PF: > { %s1599_s24 = sld [smem:[#allocation15_spill]]  ;;  %s506_s8 = sshll.u32 %s274_s27, 4  ;;  %s507_s8 = int_to_ptr.vmem [resolvable:$true] %s506_s8 }
 0x28b   : > { %s1600_s5 = sld [smem:[#allocation22_spill]]  ;;  %s493_s14 = scalar_lea.sflag [#allocation5], %s1407_s28 }
 0x28c   : > { %s978_s17 = scalar_lea.vmem %s507_s8, 128  ;;  %p1601_p13 = scmp.ne.s32.totalorder %s1590_s23, 0 }
 0x28d   : > { %p979_p10 = scmp.ne.s32.totalorder %s507_s8, %s978_s17  ;;  %s1116_s18 = smov [#allocation9]  }
 0x28e   : > { %s982_s26 = sshll.u32 %s1116_s18, 4  ;;  %s983_s26 = int_to_ptr.vmem [resolvable:$false] %s982_s26 }
 0x28f   : > { %p980_p8 = pnand %p979_p10, %p1601_p13  ;;  %s984_s4 = scalar_lea.vmem %s983_s26, 256 }
 0x290   : > { %s652_s3 = sshll.u32 %s1599_s24, 7  ;;  %p985_p11 = scmp.lt.s32.totalorder %s507_s8, %s983_s26 }
 0x291   : > { %s1501_s10 = scalar_lea.hbm %s1600_s5, %s652_s3  ;;  %p981_p9 = pneg %p980_p8 }
 0x292   : > { %p986_p4 = scmp.lt.s32.totalorder %s984_s4, %s978_s17 }
 0x294   : > { %p987_p1 = por %p986_p4, %p985_p11 }
 0x296   : > { %p988_p3 = pnand %p987_p1, %p981_p9 }
 0x298   : > { %991 = shalt.err (!%p988_p3)
}
 0x299   : > { %s992_s28 = scalar_lea.hbm %s1501_s10, 128  ;;  %s996_s9 = scalar_lea.hbm %s1600_s5, 256 }
 0x29a   : > { %p993_p6 = scmp.ne.s32.totalorder %s1501_s10, %s992_s28  ;;  %p997_p12 = scmp.lt.u32.totalorder %s1501_s10, %s1600_s5 }
 0x29b   : > { %p998_p7 = scmp.lt.u32.totalorder %s996_s9, %s992_s28  ;;  %p1000_p10 = scmp.lt.u32.totalorder %s992_s28, %s1501_s10 }
 0x29c   : > { %p994_p0 = pnand %p993_p6, %p1601_p13 }
 0x29d   : > { %p999_p2 = por %p998_p7, %p997_p12 }
 0x29e   : > { %p995_p5 = pneg %p994_p0 }
 0x29f   : > { %p1001_p8 = por %p1000_p10, %p999_p2 }
 0x2a1   : > { %p1002_p9 = pnand %p1001_p8, %p995_p5 }
 0x2a3   : > { %1005 = shalt.err (!%p1002_p9)
}
 0x2a4   : > { %771 = dma.vmem_to_hbm [thread:$0]  (%p1601_p13), %s507_s8, 128, %s1501_s10, %s493_s14  }
 0x2a5 PF: > { %p788_p11 = scmp.ge.s32.totalorder %s1104_s22, 2  ;;  %s518_s19 = sand.u32 1, %s1076_s15  }
 0x2a6   : > { %p1602_p4 = scmp.ne.s32.totalorder %s1591_s6, 0  ;;  %s519_s25 = scalar_lea.sflag [#allocation5], %s518_s19 }
 0x2a8   : > { %p784_p1 = pnand %p788_p11, %p1602_p4 }
 0x2aa   : > { %1059 = dma.done.wait (!%p784_p1), %s519_s25, 128  }
 0x2ab   : > { %1061 = vsyncadd (!%p784_p1), %s519_s25, 4294967168  ;;  %s22_s22 = sadd.s32 1, %s1104_s22   ;;  %s1603_s11 = sld [smem:[#allocation13_spill]] }
 0x2ac   : > { %p19_p3 = scmp.ge.s32.totalorder %s22_s22, 8   ;;  %s1604_s14 = sld [smem:[#allocation19_spill]] }
 0x2ad   : > { %s1605_s23 = sld [smem:[#allocation14_spill]]  ;;  %s1606_s17 = sld [smem:[#allocation20_spill]] }
 0x2ae   : > { %s1607_s19 = sld [smem:[#allocation16_spill]]  ;;  %s1608_s27 = sld [smem:[#allocation17_spill]] }
 0x2af   : > { %s1609_s21 = sld [smem:[#allocation18_spill]]  ;;  %s1610_s12 = smov %s1068_s13 }
 0x2b0   : > { %s1612_s15 = smov %s1080_s16  ;;  %s1614_s18 = smov %s1096_s20 }
 0x2b1   : > { %s1611_s13 = smov %s1603_s11  ;;  %21 = sbr.rel (!%p19_p3) target bundleno = 14 (0xe), region = 113 }
 0x2b3   : > { %s1613_s16 = smov %s1605_s23 }
 0x2b4   : > { %s1615_s20 = smov %s1608_s27 }
 0x2b8   :  { %524 = vsyncpa [#allocation4], 1 }
 0x2b9   :  { %526 = vsyncpa [#allocation4 + $0x1], 1 }
 0x2ba   :  { %527 = vsyncpa [#allocation7], 1 }
 0x2bb   :  { %529 = vsyncpa [#allocation7 + $0x1], 1 }
 0x2bc   :  { %530 = vsyncpa [#allocation5], 1 }
 0x2bd   :  { %532 = vsyncpa [#allocation5 + $0x1], 1 }

</bundles_post_ra>
